<compile_context>
chip_gen: v5e
topology: v5e:2x2
jax: 0.10.0
libtpu: 0.0.40
codegen_flags: <defaults>
</compile_context>

<pallas_src>
import functools

import jax
import jax.numpy as jnp
from jax.experimental import pallas as pl
from jax.experimental.pallas import tpu as pltpu


# --------------------------------------------------------------------------
# Pallas kernel: one batch element per grid step, fully fused forward,
# channels-first layout (C on sublanes, flattened spatial on lanes).
# --------------------------------------------------------------------------
def _res_block_kernel(x_ref, sA_ref, tA_ref, wAt_ref, bA_ref,
                      wBf_ref, bB_ref, wCt_ref, o_ref,
                      apad_ref, patch_ref, res_ref,
                      *, K, W, margin, channel_ratio):
    Cin, S = x_ref.shape[1], x_ref.shape[2]        # S  = H * W
    Cout, So = o_ref.shape[1], o_ref.shape[2]      # So = Ho * W ("wide" rows)
    Cinter = wAt_ref.shape[0]

    x = x_ref[0]                                   # (Cin, S)

    # ---- module_A: BN (folded scale/shift) -> ReLU -> 1x1 conv + bias -----
    a = jnp.maximum(x * sA_ref[...] + tA_ref[...], 0.0)               # (Cin, S)
    fA = jnp.dot(wAt_ref[...], a, preferred_element_type=jnp.float32)
    fA = fA + bA_ref[...]                                             # (Cinter, S)

    # ---- module_B: ReLU -> KxK valid conv + bias (single im2col matmul) ---
    # "Wide" trick: output pixel (ho, w) lives at flat column ho*W + w; for
    # w < Wo it equals the valid conv output, for w >= Wo it is spill that the
    # wrapper crops.  All shifts are pure lane slices (no in-kernel reshape).
    apad_ref[:, :S] = jnp.maximum(fA, 0.0)
    if K > 1:                                      # spill-over pad columns
        apad_ref[:, S:] = jnp.zeros((Cinter, K - 1), jnp.float32)
    idx = 0
    for kh in range(K):
        for kw in range(K):
            off = kh * W + kw
            patch_ref[idx * Cinter:(idx + 1) * Cinter, :] = \
                apad_ref[:, off:off + So]
            idx += 1
    fB = jnp.dot(wBf_ref[...], patch_ref[...],
                 preferred_element_type=jnp.float32) + bB_ref[...]    # (Cout, So)

    # ---- module_C: ReLU -> 1x1 conv (no bias) ------------------------------
    fC = jnp.dot(wCt_ref[...], jnp.maximum(fB, 0.0),
                 preferred_element_type=jnp.float32)                  # (Cout, So)

    # ---- residual: crop + group-of-4 channel replication (in-kernel) -------
    xr = x[:, margin * (W + 1): margin * (W + 1) + So]                # (Cin, So)
    if channel_ratio > 1:
        group_size = 4
        c_sub = Cin // group_size
        for g in range(group_size):
            blk = xr[g * c_sub:(g + 1) * c_sub, :]
            for r in range(channel_ratio):
                row = (g * channel_ratio + r) * c_sub
                res_ref[row:row + c_sub, :] = blk
        xr = res_ref[...]                                             # (Cout, So)

    o_ref[0] = xr + fC


# --------------------------------------------------------------------------
# Wrapper: NCHW in/out, parameter folding; no transposes, no x_res in HBM.
# --------------------------------------------------------------------------
@functools.partial(jax.jit, static_argnames=("kernel_size",))
def p4_res_block_forward(x_nchw, params, kernel_size=3):
    wA, bA = params["wA"], params["bA"]
    gA, betaA, muA, varA = params["gA"], params["betaA"], params["muA"], params["varA"]
    wB, bB, wC = params["wB"], params["bB"], params["wC"]

    N, Cin, H, W = x_nchw.shape
    K = kernel_size
    margin = (K - 1) // 2
    Ho, Wo = H - 2 * margin, W - 2 * margin
    Cinter = wA.shape[1]
    Cout = wC.shape[1]
    channel_ratio = Cout // Cin

    # Static shape sanity (the residual add silently assumes these).
    assert K % 2 == 1, "kernel_size must be odd"
    assert Cout == Cin * max(channel_ratio, 1), "channels_out must be a multiple of channels_in"
    if channel_ratio > 1:
        assert Cin % 4 == 0, "p4 group replication requires channels_in % 4 == 0"

    eps = 1e-5
    inv = gA / jnp.sqrt(varA + eps)
    scaleA = inv.reshape(-1, 1).astype(jnp.float32)                   # (Cin, 1)
    shiftA = (betaA - muA * inv).reshape(-1, 1).astype(jnp.float32)   # (Cin, 1)
    wA_T = wA.T.astype(jnp.float32)                                   # (Cinter, Cin)
    bA_c = bA.reshape(-1, 1).astype(jnp.float32)                      # (Cinter, 1)
    wB_f = jnp.transpose(wB, (3, 0, 1, 2)).reshape(
        Cout, K * K * Cinter).astype(jnp.float32)                     # (Cout, K*K*Cinter)
    bB_c = bB.reshape(-1, 1).astype(jnp.float32)                      # (Cout, 1)
    wC_T = wC.T.astype(jnp.float32)                                   # (Cout, Cout)

    S = H * W
    So = Ho * W                      # wide row stride; cropped to Wo afterwards
    x_flat = x_nchw.reshape(N, Cin, S).astype(jnp.float32)            # free reshape

    kernel = functools.partial(_res_block_kernel, K=K, W=W, margin=margin,
                               channel_ratio=channel_ratio)
    fixed = lambda shape: pl.BlockSpec(shape, lambda n: (0,) * len(shape))

    out_wide = pl.pallas_call(
        kernel,
        out_shape=jax.ShapeDtypeStruct((N, Cout, So), jnp.float32),
        grid_spec=pltpu.PrefetchScalarGridSpec(
            num_scalar_prefetch=0,
            grid=(N,),
            in_specs=[
                pl.BlockSpec((1, Cin, S), lambda n: (n, 0, 0)),   # x (channels-first, flat)
                fixed((Cin, 1)),                 # scaleA
                fixed((Cin, 1)),                 # shiftA
                fixed((Cinter, Cin)),            # wA^T
                fixed((Cinter, 1)),              # bA
                fixed((Cout, K * K * Cinter)),   # wB (im2col-flattened)
                fixed((Cout, 1)),                # bB
                fixed((Cout, Cout)),             # wC^T
            ],
            out_specs=pl.BlockSpec((1, Cout, So), lambda n: (n, 0, 0)),
            scratch_shapes=[
                pltpu.VMEM((Cinter, S + K - 1), jnp.float32),     # padded relu(fA)
                pltpu.VMEM((K * K * Cinter, So), jnp.float32),    # im2col patches
                pltpu.VMEM((Cout, So), jnp.float32),              # replicated residual
            ],
        ),
        compiler_params=pltpu.CompilerParams(
            dimension_semantics=("parallel",)),
    )(x_flat, scaleA, shiftA, wA_T, bA_c, wB_f, bB_c, wC_T)

    # Wide -> cropped NCHW: free reshape + one small slice (no HBM transpose).
    return out_wide.reshape(N, Cout, Ho, W)[:, :, :, :Wo]


# --------------------------------------------------------------------------
# Pure-JAX reference (same assumed p4_BLOCK semantics) for sanity checking.
# --------------------------------------------------------------------------
def _reference(x_nchw, params, kernel_size=3):
    eps = 1e-5
    x = jnp.transpose(x_nchw, (0, 2, 3, 1)).astype(jnp.float32)
    N, H, W, Cin = x.shape
    K = kernel_size
    margin = (K - 1) // 2
    Cout = params["wC"].shape[1]

    a = (x - params["muA"]) / jnp.sqrt(params["varA"] + eps) * params["gA"] + params["betaA"]
    a = jnp.maximum(a, 0.0)
    fA = jnp.einsum("nhwc,cd->nhwd", a, params["wA"]) + params["bA"]

    fAr = jnp.maximum(fA, 0.0)
    Ho, Wo = H - 2 * margin, W - 2 * margin
    fB = jnp.zeros((N, Ho, Wo, Cout), jnp.float32)
    for kh in range(K):
        for kw in range(K):
            fB = fB + jnp.einsum("nhwc,cd->nhwd",
                                 fAr[:, kh:kh + Ho, kw:kw + Wo, :],
                                 params["wB"][kh, kw])
    fB = fB + params["bB"]
    fC = jnp.einsum("nhwc,cd->nhwd", jnp.maximum(fB, 0.0), params["wC"])

    x_res = x[:, margin:-margin, margin:-margin, :] if margin > 0 else x
    ratio = Cout // Cin
    if ratio > 1:
        c_sub = Cin // 4
        oc = jnp.arange(Cout)
        in_idx = (oc // (c_sub * ratio)) * c_sub + (oc % (c_sub * ratio)) % c_sub
        x_res = x_res[..., in_idx]
    out = x_res + fC
    return jnp.transpose(out, (0, 3, 1, 2))


if __name__ == "__main__":
    # Small shapes consistent with the module: group_size=4 => Cin % 4 == 0.
    N, Cin, Cinter, Cout, H, W, K = 2, 4, 8, 8, 16, 16, 3

    key = jax.random.PRNGKey(0)
    ks = jax.random.split(key, 8)
    x = jax.random.normal(ks[0], (N, Cin, H, W), jnp.float32)

    params = {
        # module_A: 1x1 conv, bn=True, bias=True
        "wA": 0.3 * jax.random.normal(ks[1], (Cin, Cinter), jnp.float32),
        "bA": 0.1 * jax.random.normal(ks[2], (Cinter,), jnp.float32),
        "gA": 1.0 + 0.05 * jnp.arange(Cin, dtype=jnp.float32),
        "betaA": 0.02 * jnp.arange(Cin, dtype=jnp.float32),
        "muA": 0.01 * jnp.arange(Cin, dtype=jnp.float32),
        "varA": 1.0 + 0.1 * jnp.arange(Cin, dtype=jnp.float32),
        # module_B: KxK conv (valid), bn=False, bias=True
        "wB": 0.2 * jax.random.normal(ks[3], (K, K, Cinter, Cout), jnp.float32),
        "bB": 0.1 * jax.random.normal(ks[4], (Cout,), jnp.float32),
        # module_C: 1x1 conv, bn=False, bias=False
        "wC": 0.3 * jax.random.normal(ks[5], (Cout, Cout), jnp.float32),
    }

    y = p4_res_block_forward(x, params, kernel_size=K)
    y = jax.block_until_ready(y)

    y_ref = jax.block_until_ready(_reference(x, params, kernel_size=K))
    assert y.shape == (N, Cout, H - (K - 1), W - (K - 1)), y.shape
    assert jnp.allclose(y, y_ref, atol=1e-4, rtol=1e-4), "mismatch vs JAX reference"

    print("KERNEL_OK")
</pallas_src>

<mosaic_0001>
module attributes {stable_mosaic.version = 11 : i64} {
  func.func @_res_block_kernel(%arg0: i32, %arg1: memref<1x4x256xf32, #tpu.memory_space<vmem>>, %arg2: memref<4x1xf32, #tpu.memory_space<vmem>>, %arg3: memref<4x1xf32, #tpu.memory_space<vmem>>, %arg4: memref<8x4xf32, #tpu.memory_space<vmem>>, %arg5: memref<8x1xf32, #tpu.memory_space<vmem>>, %arg6: memref<8x72xf32, #tpu.memory_space<vmem>>, %arg7: memref<8x1xf32, #tpu.memory_space<vmem>>, %arg8: memref<8x8xf32, #tpu.memory_space<vmem>>, %arg9: memref<1x8x224xf32, #tpu.memory_space<vmem>>, %arg10: memref<8x258xf32, #tpu.memory_space<vmem>>, %arg11: memref<72x224xf32, #tpu.memory_space<vmem>>, %arg12: memref<8x224xf32, #tpu.memory_space<vmem>>) attributes {dimension_semantics = [#tpu.dimension_semantics<parallel>], iteration_bounds = array<i64: 2>, scalar_prefetch = 0 : i64, scratch_operands = 3 : i64, tpu.core_type = #tpu.core_type<tc>, window_params = [{transform_indices = @transform_0, window_bounds = array<i64: 1, 4, 256>}, {pipeline_mode = #tpu.pipeline_mode<synchronous>, transform_indices = @transform_1, window_bounds = array<i64: 4, 1>}, {pipeline_mode = #tpu.pipeline_mode<synchronous>, transform_indices = @transform_2, window_bounds = array<i64: 4, 1>}, {pipeline_mode = #tpu.pipeline_mode<synchronous>, transform_indices = @transform_3, window_bounds = array<i64: 8, 4>}, {pipeline_mode = #tpu.pipeline_mode<synchronous>, transform_indices = @transform_4, window_bounds = array<i64: 8, 1>}, {pipeline_mode = #tpu.pipeline_mode<synchronous>, transform_indices = @transform_5, window_bounds = array<i64: 8, 72>}, {pipeline_mode = #tpu.pipeline_mode<synchronous>, transform_indices = @transform_6, window_bounds = array<i64: 8, 1>}, {pipeline_mode = #tpu.pipeline_mode<synchronous>, transform_indices = @transform_7, window_bounds = array<i64: 8, 8>}, {transform_indices = @transform_8, window_bounds = array<i64: 1, 8, 224>}]} {
    %c0 = arith.constant 0 : index
    %c0_0 = arith.constant 0 : index
    %c0_1 = arith.constant 0 : index
    %0 = vector.load %arg1[%c0, %c0_0, %c0_1] : memref<1x4x256xf32, #tpu.memory_space<vmem>>, vector<1x4x256xf32>
    %1 = vector.shape_cast %0 : vector<1x4x256xf32> to vector<4x256xf32>
    %c0_2 = arith.constant 0 : index
    %c0_3 = arith.constant 0 : index
    %2 = vector.load %arg2[%c0_2, %c0_3] : memref<4x1xf32, #tpu.memory_space<vmem>>, vector<4x1xf32>
    %3 = vector.broadcast %2 : vector<4x1xf32> to vector<4x256xf32>
    %4 = arith.mulf %1, %3 : vector<4x256xf32>
    %c0_4 = arith.constant 0 : index
    %c0_5 = arith.constant 0 : index
    %5 = vector.load %arg3[%c0_4, %c0_5] : memref<4x1xf32, #tpu.memory_space<vmem>>, vector<4x1xf32>
    %6 = vector.broadcast %5 : vector<4x1xf32> to vector<4x256xf32>
    %7 = arith.addf %4, %6 : vector<4x256xf32>
    %cst = arith.constant 0.000000e+00 : f32
    %8 = vector.broadcast %cst : f32 to vector<4x256xf32>
    %9 = arith.maximumf %7, %8 : vector<4x256xf32>
    %c0_6 = arith.constant 0 : index
    %c0_7 = arith.constant 0 : index
    %10 = vector.load %arg4[%c0_6, %c0_7] : memref<8x4xf32, #tpu.memory_space<vmem>>, vector<8x4xf32>
    %cst_8 = arith.constant dense<0.000000e+00> : vector<8x256xf32>
    %11 = tpu.matmul %10, %9, %cst_8 {dimension_numbers = #tpu.dot_dimension_numbers<[1], [0], [0], [1], [0, 0, 1, 1], [], []>} : vector<8x4xf32>, vector<4x256xf32>, vector<8x256xf32> -> vector<8x256xf32>
    %c0_9 = arith.constant 0 : index
    %c0_10 = arith.constant 0 : index
    %12 = vector.load %arg5[%c0_9, %c0_10] : memref<8x1xf32, #tpu.memory_space<vmem>>, vector<8x1xf32>
    %13 = vector.broadcast %12 : vector<8x1xf32> to vector<8x256xf32>
    %14 = arith.addf %11, %13 : vector<8x256xf32>
    %cst_11 = arith.constant 0.000000e+00 : f32
    %15 = vector.broadcast %cst_11 : f32 to vector<8x256xf32>
    %16 = arith.maximumf %14, %15 : vector<8x256xf32>
    %c0_12 = arith.constant 0 : index
    %c0_13 = arith.constant 0 : index
    %17 = vector.load %arg10[%c0_12, %c0_13] : memref<8x258xf32, #tpu.memory_space<vmem>>, vector<8x256xf32>
    tpu.vector_store %arg10[%c0_12, %c0_13], %16 {strides = array<i32>} : memref<8x258xf32, #tpu.memory_space<vmem>>, vector<8x256xf32>,
    %cst_14 = arith.constant 0.000000e+00 : f32
    %18 = vector.broadcast %cst_14 : f32 to vector<8x2xf32>
    %c0_15 = arith.constant 0 : index
    %c256 = arith.constant 256 : index
    %19 = vector.load %arg10[%c0_15, %c256] : memref<8x258xf32, #tpu.memory_space<vmem>>, vector<8x2xf32>
    tpu.vector_store %arg10[%c0_15, %c256], %18 {strides = array<i32>} : memref<8x258xf32, #tpu.memory_space<vmem>>, vector<8x2xf32>,
    %c0_16 = arith.constant 0 : index
    %c0_17 = arith.constant 0 : index
    %20 = vector.load %arg10[%c0_16, %c0_17] : memref<8x258xf32, #tpu.memory_space<vmem>>, vector<8x224xf32>
    %c0_18 = arith.constant 0 : index
    %c0_19 = arith.constant 0 : index
    %21 = vector.load %arg11[%c0_18, %c0_19] : memref<72x224xf32, #tpu.memory_space<vmem>>, vector<8x224xf32>
    tpu.vector_store %arg11[%c0_18, %c0_19], %20 {strides = array<i32>} : memref<72x224xf32, #tpu.memory_space<vmem>>, vector<8x224xf32>,
    %c0_20 = arith.constant 0 : index
    %c1 = arith.constant 1 : index
    %22 = vector.load %arg10[%c0_20, %c1] : memref<8x258xf32, #tpu.memory_space<vmem>>, vector<8x224xf32>
    %c8 = arith.constant 8 : index
    %c0_21 = arith.constant 0 : index
    %23 = vector.load %arg11[%c8, %c0_21] : memref<72x224xf32, #tpu.memory_space<vmem>>, vector<8x224xf32>
    tpu.vector_store %arg11[%c8, %c0_21], %22 {strides = array<i32>} : memref<72x224xf32, #tpu.memory_space<vmem>>, vector<8x224xf32>,
    %c0_22 = arith.constant 0 : index
    %c2 = arith.constant 2 : index
    %24 = vector.load %arg10[%c0_22, %c2] : memref<8x258xf32, #tpu.memory_space<vmem>>, vector<8x224xf32>
    %c16 = arith.constant 16 : index
    %c0_23 = arith.constant 0 : index
    %25 = vector.load %arg11[%c16, %c0_23] : memref<72x224xf32, #tpu.memory_space<vmem>>, vector<8x224xf32>
    tpu.vector_store %arg11[%c16, %c0_23], %24 {strides = array<i32>} : memref<72x224xf32, #tpu.memory_space<vmem>>, vector<8x224xf32>,
    %c0_24 = arith.constant 0 : index
    %c16_25 = arith.constant 16 : index
    %26 = vector.load %arg10[%c0_24, %c16_25] : memref<8x258xf32, #tpu.memory_space<vmem>>, vector<8x224xf32>
    %c24 = arith.constant 24 : index
    %c0_26 = arith.constant 0 : index
    %27 = vector.load %arg11[%c24, %c0_26] : memref<72x224xf32, #tpu.memory_space<vmem>>, vector<8x224xf32>
    tpu.vector_store %arg11[%c24, %c0_26], %26 {strides = array<i32>} : memref<72x224xf32, #tpu.memory_space<vmem>>, vector<8x224xf32>,
    %c0_27 = arith.constant 0 : index
    %c17 = arith.constant 17 : index
    %28 = vector.load %arg10[%c0_27, %c17] : memref<8x258xf32, #tpu.memory_space<vmem>>, vector<8x224xf32>
    %c32 = arith.constant 32 : index
    %c0_28 = arith.constant 0 : index
    %29 = vector.load %arg11[%c32, %c0_28] : memref<72x224xf32, #tpu.memory_space<vmem>>, vector<8x224xf32>
    tpu.vector_store %arg11[%c32, %c0_28], %28 {strides = array<i32>} : memref<72x224xf32, #tpu.memory_space<vmem>>, vector<8x224xf32>,
    %c0_29 = arith.constant 0 : index
    %c18 = arith.constant 18 : index
    %30 = vector.load %arg10[%c0_29, %c18] : memref<8x258xf32, #tpu.memory_space<vmem>>, vector<8x224xf32>
    %c40 = arith.constant 40 : index
    %c0_30 = arith.constant 0 : index
    %31 = vector.load %arg11[%c40, %c0_30] : memref<72x224xf32, #tpu.memory_space<vmem>>, vector<8x224xf32>
    tpu.vector_store %arg11[%c40, %c0_30], %30 {strides = array<i32>} : memref<72x224xf32, #tpu.memory_space<vmem>>, vector<8x224xf32>,
    %c0_31 = arith.constant 0 : index
    %c32_32 = arith.constant 32 : index
    %32 = vector.load %arg10[%c0_31, %c32_32] : memref<8x258xf32, #tpu.memory_space<vmem>>, vector<8x224xf32>
    %c48 = arith.constant 48 : index
    %c0_33 = arith.constant 0 : index
    %33 = vector.load %arg11[%c48, %c0_33] : memref<72x224xf32, #tpu.memory_space<vmem>>, vector<8x224xf32>
    tpu.vector_store %arg11[%c48, %c0_33], %32 {strides = array<i32>} : memref<72x224xf32, #tpu.memory_space<vmem>>, vector<8x224xf32>,
    %c0_34 = arith.constant 0 : index
    %c33 = arith.constant 33 : index
    %34 = vector.load %arg10[%c0_34, %c33] : memref<8x258xf32, #tpu.memory_space<vmem>>, vector<8x224xf32>
    %c56 = arith.constant 56 : index
    %c0_35 = arith.constant 0 : index
    %35 = vector.load %arg11[%c56, %c0_35] : memref<72x224xf32, #tpu.memory_space<vmem>>, vector<8x224xf32>
    tpu.vector_store %arg11[%c56, %c0_35], %34 {strides = array<i32>} : memref<72x224xf32, #tpu.memory_space<vmem>>, vector<8x224xf32>,
    %c0_36 = arith.constant 0 : index
    %c34 = arith.constant 34 : index
    %36 = vector.load %arg10[%c0_36, %c34] : memref<8x258xf32, #tpu.memory_space<vmem>>, vector<8x224xf32>
    %c64 = arith.constant 64 : index
    %c0_37 = arith.constant 0 : index
    %37 = vector.load %arg11[%c64, %c0_37] : memref<72x224xf32, #tpu.memory_space<vmem>>, vector<8x224xf32>
    tpu.vector_store %arg11[%c64, %c0_37], %36 {strides = array<i32>} : memref<72x224xf32, #tpu.memory_space<vmem>>, vector<8x224xf32>,
    %c0_38 = arith.constant 0 : index
    %c0_39 = arith.constant 0 : index
    %38 = vector.load %arg6[%c0_38, %c0_39] : memref<8x72xf32, #tpu.memory_space<vmem>>, vector<8x72xf32>
    %c0_40 = arith.constant 0 : index
    %c0_41 = arith.constant 0 : index
    %39 = vector.load %arg11[%c0_40, %c0_41] : memref<72x224xf32, #tpu.memory_space<vmem>>, vector<72x224xf32>
    %cst_42 = arith.constant dense<0.000000e+00> : vector<8x224xf32>
    %40 = tpu.matmul %38, %39, %cst_42 {dimension_numbers = #tpu.dot_dimension_numbers<[1], [0], [0], [1], [0, 0, 1, 1], [], []>} : vector<8x72xf32>, vector<72x224xf32>, vector<8x224xf32> -> vector<8x224xf32>
    %c0_43 = arith.constant 0 : index
    %c0_44 = arith.constant 0 : index
    %41 = vector.load %arg7[%c0_43, %c0_44] : memref<8x1xf32, #tpu.memory_space<vmem>>, vector<8x1xf32>
    %42 = vector.broadcast %41 : vector<8x1xf32> to vector<8x224xf32>
    %43 = arith.addf %40, %42 : vector<8x224xf32>
    %c0_45 = arith.constant 0 : index
    %c0_46 = arith.constant 0 : index
    %44 = vector.load %arg8[%c0_45, %c0_46] : memref<8x8xf32, #tpu.memory_space<vmem>>, vector<8x8xf32>
    %cst_47 = arith.constant 0.000000e+00 : f32
    %45 = vector.broadcast %cst_47 : f32 to vector<8x224xf32>
    %46 = arith.maximumf %43, %45 : vector<8x224xf32>
    %cst_48 = arith.constant dense<0.000000e+00> : vector<8x224xf32>
    %47 = tpu.matmul %44, %46, %cst_48 {dimension_numbers = #tpu.dot_dimension_numbers<[1], [0], [0], [1], [0, 0, 1, 1], [], []>} : vector<8x8xf32>, vector<8x224xf32>, vector<8x224xf32> -> vector<8x224xf32>
    %48 = vector.extract_strided_slice %1 {offsets = [0, 17], sizes = [4, 224], strides = [1, 1]} : vector<4x256xf32> to vector<4x224xf32>
    %49 = vector.extract_strided_slice %48 {offsets = [0, 0], sizes = [1, 224], strides = [1, 1]} : vector<4x224xf32> to vector<1x224xf32>
    %c0_49 = arith.constant 0 : index
    %c0_50 = arith.constant 0 : index
    %50 = vector.load %arg12[%c0_49, %c0_50] : memref<8x224xf32, #tpu.memory_space<vmem>>, vector<1x224xf32>
    tpu.vector_store %arg12[%c0_49, %c0_50], %49 {strides = array<i32>} : memref<8x224xf32, #tpu.memory_space<vmem>>, vector<1x224xf32>,
    %c1_51 = arith.constant 1 : index
    %c0_52 = arith.constant 0 : index
    %51 = vector.load %arg12[%c1_51, %c0_52] : memref<8x224xf32, #tpu.memory_space<vmem>>, vector<1x224xf32>
    tpu.vector_store %arg12[%c1_51, %c0_52], %49 {strides = array<i32>} : memref<8x224xf32, #tpu.memory_space<vmem>>, vector<1x224xf32>,
    %52 = vector.extract_strided_slice %48 {offsets = [1, 0], sizes = [1, 224], strides = [1, 1]} : vector<4x224xf32> to vector<1x224xf32>
    %c2_53 = arith.constant 2 : index
    %c0_54 = arith.constant 0 : index
    %53 = vector.load %arg12[%c2_53, %c0_54] : memref<8x224xf32, #tpu.memory_space<vmem>>, vector<1x224xf32>
    tpu.vector_store %arg12[%c2_53, %c0_54], %52 {strides = array<i32>} : memref<8x224xf32, #tpu.memory_space<vmem>>, vector<1x224xf32>,
    %c3 = arith.constant 3 : index
    %c0_55 = arith.constant 0 : index
    %54 = vector.load %arg12[%c3, %c0_55] : memref<8x224xf32, #tpu.memory_space<vmem>>, vector<1x224xf32>
    tpu.vector_store %arg12[%c3, %c0_55], %52 {strides = array<i32>} : memref<8x224xf32, #tpu.memory_space<vmem>>, vector<1x224xf32>,
    %55 = vector.extract_strided_slice %48 {offsets = [2, 0], sizes = [1, 224], strides = [1, 1]} : vector<4x224xf32> to vector<1x224xf32>
    %c4 = arith.constant 4 : index
    %c0_56 = arith.constant 0 : index
    %56 = vector.load %arg12[%c4, %c0_56] : memref<8x224xf32, #tpu.memory_space<vmem>>, vector<1x224xf32>
    tpu.vector_store %arg12[%c4, %c0_56], %55 {strides = array<i32>} : memref<8x224xf32, #tpu.memory_space<vmem>>, vector<1x224xf32>,
    %c5 = arith.constant 5 : index
    %c0_57 = arith.constant 0 : index
    %57 = vector.load %arg12[%c5, %c0_57] : memref<8x224xf32, #tpu.memory_space<vmem>>, vector<1x224xf32>
    tpu.vector_store %arg12[%c5, %c0_57], %55 {strides = array<i32>} : memref<8x224xf32, #tpu.memory_space<vmem>>, vector<1x224xf32>,
    %58 = vector.extract_strided_slice %48 {offsets = [3, 0], sizes = [1, 224], strides = [1, 1]} : vector<4x224xf32> to vector<1x224xf32>
    %c6 = arith.constant 6 : index
    %c0_58 = arith.constant 0 : index
    %59 = vector.load %arg12[%c6, %c0_58] : memref<8x224xf32, #tpu.memory_space<vmem>>, vector<1x224xf32>
    tpu.vector_store %arg12[%c6, %c0_58], %58 {strides = array<i32>} : memref<8x224xf32, #tpu.memory_space<vmem>>, vector<1x224xf32>,
    %c7 = arith.constant 7 : index
    %c0_59 = arith.constant 0 : index
    %60 = vector.load %arg12[%c7, %c0_59] : memref<8x224xf32, #tpu.memory_space<vmem>>, vector<1x224xf32>
    tpu.vector_store %arg12[%c7, %c0_59], %58 {strides = array<i32>} : memref<8x224xf32, #tpu.memory_space<vmem>>, vector<1x224xf32>,
    %c0_60 = arith.constant 0 : index
    %c0_61 = arith.constant 0 : index
    %61 = vector.load %arg12[%c0_60, %c0_61] : memref<8x224xf32, #tpu.memory_space<vmem>>, vector<8x224xf32>
    %62 = arith.addf %61, %47 : vector<8x224xf32>
    %c0_62 = arith.constant 0 : index
    %c0_63 = arith.constant 0 : index
    %c0_64 = arith.constant 0 : index
    %63 = vector.load %arg9[%c0_62, %c0_63, %c0_64] : memref<1x8x224xf32, #tpu.memory_space<vmem>>, vector<1x8x224xf32>
    %64 = vector.shape_cast %63 : vector<1x8x224xf32> to vector<8x224xf32>
    %65 = vector.shape_cast %62 : vector<8x224xf32> to vector<1x8x224xf32>
    tpu.vector_store %arg9[%c0_62, %c0_63, %c0_64], %65 {strides = array<i32>} : memref<1x8x224xf32, #tpu.memory_space<vmem>>, vector<1x8x224xf32>,
    return
  }
  func.func @transform_0(%arg0: i32) -> (i32, i32, i32) {
    %c0_i32 = arith.constant 0 : i32
    %c0_i32_0 = arith.constant 0 : i32
    %c0_i32_1 = arith.constant 0 : i32
    return %arg0, %c0_i32, %c0_i32_0 : i32, i32, i32
  }
  func.func @transform_1(%arg0: i32) -> (i32, i32) {
    %c0_i32 = arith.constant 0 : i32
    %c0_i32_0 = arith.constant 0 : i32
    %c0_i32_1 = arith.constant 0 : i32
    return %c0_i32, %c0_i32_0 : i32, i32
  }
  func.func @transform_2(%arg0: i32) -> (i32, i32) {
    %c0_i32 = arith.constant 0 : i32
    %c0_i32_0 = arith.constant 0 : i32
    %c0_i32_1 = arith.constant 0 : i32
    return %c0_i32, %c0_i32_0 : i32, i32
  }
  func.func @transform_3(%arg0: i32) -> (i32, i32) {
    %c0_i32 = arith.constant 0 : i32
    %c0_i32_0 = arith.constant 0 : i32
    %c0_i32_1 = arith.constant 0 : i32
    return %c0_i32, %c0_i32_0 : i32, i32
  }
  func.func @transform_4(%arg0: i32) -> (i32, i32) {
    %c0_i32 = arith.constant 0 : i32
    %c0_i32_0 = arith.constant 0 : i32
    %c0_i32_1 = arith.constant 0 : i32
    return %c0_i32, %c0_i32_0 : i32, i32
  }
  func.func @transform_5(%arg0: i32) -> (i32, i32) {
    %c0_i32 = arith.constant 0 : i32
    %c0_i32_0 = arith.constant 0 : i32
    %c0_i32_1 = arith.constant 0 : i32
    return %c0_i32, %c0_i32_0 : i32, i32
  }
  func.func @transform_6(%arg0: i32) -> (i32, i32) {
    %c0_i32 = arith.constant 0 : i32
    %c0_i32_0 = arith.constant 0 : i32
    %c0_i32_1 = arith.constant 0 : i32
    return %c0_i32, %c0_i32_0 : i32, i32
  }
  func.func @transform_7(%arg0: i32) -> (i32, i32) {
    %c0_i32 = arith.constant 0 : i32
    %c0_i32_0 = arith.constant 0 : i32
    %c0_i32_1 = arith.constant 0 : i32
    return %c0_i32, %c0_i32_0 : i32, i32
  }
  func.func @transform_8(%arg0: i32) -> (i32, i32, i32) {
    %c0_i32 = arith.constant 0 : i32
    %c0_i32_0 = arith.constant 0 : i32
    %c0_i32_1 = arith.constant 0 : i32
    return %arg0, %c0_i32, %c0_i32_0 : i32, i32, i32
  }
}

</mosaic_0001>

<bundles_post_ra>
// kernel: p4_res_block_forward.1
= control target key start
LH: loop header
LB: loop body
LE: loop exit
PB: predicated region body
PF: predicated region fallthrough
CT: control target
= control target key end

     0   :  { %s889_s27 = smov 0   ;;  %s992_s0 = inlined_call_operand.vmem [shape: f32[2,4,256], index: 0, kind: input, shape index: {}]   ;;  %s993_s1 = inlined_call_operand.vmem [shape: f32[4,1], index: 1, kind: input, shape index: {}]   ;;  %s994_s2 = inlined_call_operand.vmem [shape: f32[4,1], index: 2, kind: input, shape index: {}]   ;;  %s995_s3 = inlined_call_operand.vmem [shape: f32[8,4], index: 3, kind: input, shape index: {}]   ;;  %s996_s4 = inlined_call_operand.vmem [shape: f32[8,1], index: 4, kind: input, shape index: {}]   ;;  %s997_s5 = inlined_call_operand.vmem [shape: f32[8,72], index: 5, kind: input, shape index: {}]   ;;  %s998_s6 = inlined_call_operand.vmem [shape: f32[8,1], index: 6, kind: input, shape index: {}]   ;;  %s999_s7 = inlined_call_operand.vmem [shape: f32[8,8], index: 7, kind: input, shape index: {}]   ;;  %s1000_s8 = inlined_call_operand.vmem [shape: f32[2,8,224], index: 8, kind: output, shape index: {}]  }
   0x1 LB: > { %s783_s28 = sadd.s32 4294967295, %s831_s27   ;;  %p787_p0 = scmp.ge.s32.totalorder %s831_s27, 1  ;;  %s831_s27 = sphi %s889_s27, %s18_s27  }
   0x2   : > { %p262_p1 = scmp.lt.s32.totalorder %s831_s27, 3 }
   0x4   : > { %p263_p2 = pnand %p787_p0, %p262_p1 }
   0x5   : > { %p296_p3 = scmp.lt.s32.totalorder (!%p263_p2), %s783_s28, 1  ;;  %s836_s19 = smov (!%p263_p2), 94  }
   0x6   : > { %266 = sbr.rel (%p263_p2) target bundleno = 709 (0x2c5), region = 52  ;;  %s837_s20 = smov (!%p263_p2), 95  }
   0x7   : > { %s838_s21 = smov (!%p263_p2), 110   ;;  %s839_s22 = smov (!%p263_p2), 96  }
   0x8   : > { %s840_s23 = smov (!%p263_p2), 111   ;;  %s841_s24 = smov (!%p263_p2), 126  }
   0x9   : > { %s842_s25 = smov (!%p263_p2), 112   ;;  %s843_s26 = smov (!%p263_p2), 127  }
   0xb   : > { %v307_v0 = vld [vmem:[%s993_s1] sm:$0xf]  ;;  %v833_v1 = vmov 0   ;;  %s1004_s28 = smov (!%p296_p3, %s783_s28), 1  ;;  %v834_v3 = vmov 839922192   ;;  %v647_v53 = vlaneseq }
   0xc   : > { %823 = vset.pattern.permute.xlu0 %v833_v1  ;;  %824 = vset.pattern.permute.xlu1 %v833_v1  ;;  %v318_v2 = vld [vmem:[%s994_s2] sm:$0xf]  ;;  %v313_v4 = vunpack.c.l.s4 %v834_v3  ;;  %s802_s11 = sshll.u32 %s1004_s28, 3  ;;  %vm394_vm0 = vcmask 15360   ;;  %v835_v15 = vmov 0.0   ;;  %vm345_vm1 = vcmask 1043456  }
   0xd   : > { %310 = vperm.xlu0 %823, %v307_v0   ;;  %v331_v7 = vld [vmem:[%s996_s4] sm:$0xff]  ;;  %s300_s16 = scalar_lea.vmem %s992_s0, %s802_s11  ;;  %395 = vst.msk [vmem:[#allocation2 + $0x10] sm:$0xff] %vm394_vm0, %v835_v15  ;;  %vm341_vm2 = vcmask 31744   ;;  %vm399_vm3 = vcmask 785408   ;;  %vm640_vm4 = vcmask 1040384   ;;  %vm515_vm5 = vcmask 769024  }
   0xe   : > { %v314_v6 = vunpack.c.0.s8 %v313_v4  ;;  %334 = vperm.xlu1 %824, %v331_v7   ;;  %v912_v9 = vld [vmem:[%s300_s16] sm:$0xff]  ;;  %vm496_vm6 = vcmask 777216   ;;  %vm465_vm7 = vcmask 900096   ;;  %vm451_vm8 = vcmask 908288   ;;  %s803_s13 = sshll.u32 %s1004_s28, 4 }
   0xf   : > { %v330_v16 = vld [vmem:[%s995_s3] sm:$0xff]  ;;  %v639_v33 = vrot.slane %v912_v9, 3  ;;  %vm948_vm9 = vcmp.lt.s32.totalorder %v647_v53, 224  ;;  %vm437_vm10 = vcmask 916480   ;;  %vm423_vm11 = vcmask 1031168   ;;  %s305_s16 = scalar_lea.vmem %s1000_s8, %s803_s13 }
  0x10   : > { %v541_v32 = vld [vmem:[%s998_s6] sm:$0xff]  ;;  %vm409_vm12 = vcmask 1039360   ;;  %vm547_vm13 = vcmask 588800   ;;  %vm594_vm14 = vcmask 64512  }
  0x11   : > { %v641_v34 = vsel %vm640_vm4, %v912_v9, %v639_v33  ;;  %v522_v15 = vld [vmem:[%s997_s5] sm:$0xff] }
  0x14   : > { %v505_v19 = vld [vmem:[#allocation2 + $0x10] sm:$0xff] }
  0x15   : > { %321 = vperm.xlu0 %823, %v318_v2   ;;  %513 = vrot.lane.b32.xlu2 %v505_v19, %s836_s19 }
  0x1d   : > { %494 = vrot.lane.b32.xlu2 %v505_v19, %s837_s20 }
  0x6f   : > { %v514_v36 = vpop.permute.xlu2 %513 }
  0x77   : > { %v495_v37 = vpop.permute.xlu2 %494 }
  0x7f   : > { %v311_v5 = vpop.permute.xlu0 %310 }
  0x80   : > { %v315_v8 = vperm.slane %v311_v5, %v314_v6  ;;  %v335_v24 = vpop.permute.xlu1 %334 }
  0x82   : > { %v317_v11 = vmul.f32 %v315_v8, %v912_v9 }
  0x87   : > { %v322_v10 = vpop.permute.xlu0 %321 }
  0x88   : > { %v326_v12 = vperm.slane %v322_v10, %v314_v6 }
  0x8a   : > { %v328_v13 = vadd.f32 %v326_v12, %v317_v11 }
  0x8c   : > { %v329_v14 = vmax.f32 %v328_v13, 0.0 }
  0x8e   : > { %338 = vst [vmem:[#allocation1] ss:$2 sm:$0xff] %v329_v14 }
  0x95   : > { %v339_v17 = vld.sshfl [vmem:[#allocation1] sm:$0xff pattern:$0x75316420]  ;;  %v340_v18 = vld.sshfl [vmem:[#allocation1 + $0x8] sm:$0xff pattern:$0x75316420] }
  0x96   : > { %792 = vmatpush.msk.msra.mxu0 %vm345_vm1, %v339_v17  ;;  %656 = vst [vmem:[#allocation1] sm:$0xff] %v912_v9  ;;  %794 = vmatpush.msk.msra.mxu1 %vm345_vm1, %v340_v18 }
  0x97   : > { %793 = vmatmul.msk.f32.vlgmr.msra.gmra.mxu0 %vm341_vm2, %v330_v16  ;;  %795 = vmatmul.msk.f32.vlgmr.msra.gmra.mxu1 %vm341_vm2, %v330_v16 }
  0x9d   : > { %v658_v20 = vld [vmem:[#allocation1 + $0x1] ss:$4 sm:$0xff] }
  0x9e   : > { %667 = vst [vmem:[#allocation1] sm:$0xff] %v912_v9 }
  0xa5   : > { %v669_v21 = vld [vmem:[#allocation1 + $0x1] ss:$4 sm:$0xff] }
  0xa6   : > { %678 = vst [vmem:[#allocation1] sm:$0xff] %v912_v9 }
  0xad   : > { %v680_v22 = vld [vmem:[#allocation1 + $0x2] ss:$4 sm:$0xff] }
  0xae   : > { %689 = vst [vmem:[#allocation1] sm:$0xff] %v912_v9 }
  0xb5   : > { %v691_v23 = vld [vmem:[#allocation1 + $0x2] ss:$4 sm:$0xff] }
  0xb6   : > { %700 = vst [vmem:[#allocation1] sm:$0xff] %v912_v9 }
  0xbd   : > { %v702_v31 = vld [vmem:[#allocation1 + $0x3] ss:$4 sm:$0xff] }
  0xbe   : > { %711 = vst [vmem:[#allocation1] sm:$0xff] %v912_v9 }
  0xc5   : > { %v713_v35 = vld [vmem:[#allocation1 + $0x3] ss:$4 sm:$0xff] }
 0x114   : > { %v367_v25 = vpop.f32.mrf.mxu0  ;;  %v387_v26 = vpop.f32.mrf.mxu1 }
 0x115   : > { %v368_v27 = vadd.f32 %v367_v25, %v335_v24  ;;  %v388_v28 = vadd.f32 %v387_v26, %v335_v24 }
 0x117   : > { %v923_v29 = vmax.f32 %v368_v27, 0.0  ;;  %v391_v30 = vmax.f32 %v388_v28, 0.0 }
 0x119   : > { %511 = vrot.lane.b32.xlu2 %v391_v30, %s836_s19  ;;  %509 = vrot.lane.b32.xlu1 %v923_v29, %s836_s19  ;;  %400 = vst.msk [vmem:[#allocation3 + $0x8] sm:$0xff] %vm399_vm3, %v391_v30 }
 0x11a   : > { %490 = vrot.lane.b32.xlu0 %v923_v29, %s837_s20 }
 0x120   : > { %v524_v18 = vld [vmem:[#allocation3 + $0x8] sm:$0xff] }
 0x121   : > { %492 = vrot.lane.b32.xlu1 %v391_v30, %s837_s20  ;;  %461 = vrot.lane.b32.xlu2 %v923_v29, %s838_s21 }
 0x122   : > { %475 = vrot.lane.b32.xlu0 %v923_v29, %s839_s22 }
 0x129   : > { %477 = vrot.lane.b32.xlu1 %v391_v30, %s839_s22  ;;  %449 = vrot.lane.b32.xlu2 %v391_v30, %s840_s23 }
 0x12a   : > { %463 = vrot.lane.b32.xlu0 %v391_v30, %s838_s21 }
 0x131   : > { %447 = vrot.lane.b32.xlu1 %v923_v29, %s840_s23  ;;  %419 = vrot.lane.b32.xlu2 %v923_v29, %s841_s24 }
 0x132   : > { %433 = vrot.lane.b32.xlu0 %v923_v29, %s842_s25 }
 0x139   : > { %435 = vrot.lane.b32.xlu1 %v391_v30, %s842_s25  ;;  %407 = vrot.lane.b32.xlu2 %v391_v30, %s843_s26 }
 0x13a   : > { %421 = vrot.lane.b32.xlu0 %v391_v30, %s841_s24 }
 0x141   : > { %659 = vrot.lane.b32.xlu2 %v658_v20, %s840_s23  ;;  %405 = vrot.lane.b32.xlu1 %v923_v29, %s843_s26 }
 0x142   : > { %544 = vperm.xlu0 %823, %v541_v32  }
 0x149   : > { %692 = vrot.lane.b32.xlu2 %v691_v23, %s840_s23  ;;  %642 = vrot.lane.b32.xlu1 %v641_v34, %s840_s23 }
 0x14a   : > { %670 = vrot.lane.b32.xlu0 %v669_v21, %s840_s23 }
 0x151   : > { %681 = vrot.lane.b32.xlu1 %v680_v22, %s840_s23 }
 0x152   : > { %703 = vrot.lane.b32.xlu0 %v702_v31, %s840_s23 }
 0x159   : > { %714 = vrot.lane.b32.xlu1 %v713_v35, %s840_s23 }
 0x173   : > { %v512_v38 = vpop.permute.xlu2 %511 }
 0x174   : > { %v517_v39 = vsel %vm515_vm5, %v512_v38, %v514_v36 }
 0x175   : > { %521 = vst.msk [vmem:[#allocation3 + $0x88] sm:$0xff] %vm399_vm3, %v517_v39 }
 0x17b   : > { %v462_v40 = vpop.permute.xlu2 %461 }
 0x17c   : > { %v540_v41 = vld [vmem:[#allocation3 + $0x88] sm:$0xff] }
 0x17d   : > { %578 = vmatpush.msra.mxu3 %v540_v41 }
 0x183   : > { %v450_v42 = vpop.permute.xlu2 %449 }
 0x184   : > { %456 = vst.msk [vmem:[#allocation3 + $0x48] sm:$0xff] %vm399_vm3, %v450_v42 }
 0x18b   : > { %v510_v43 = vpop.permute.xlu1 %509  ;;  %v420_v44 = vpop.permute.xlu2 %419  ;;  %v532_v6 = vld [vmem:[#allocation3 + $0x48] sm:$0xff] }
 0x18c   : > { %v516_v45 = vsel %vm515_vm5, %v510_v43, %v512_v38  ;;  %v491_v46 = vpop.permute.xlu0 %490 }
 0x18d   : > { %558 = vmatpush.msra.mxu2 %v516_v45 }
 0x193   : > { %v493_v47 = vpop.permute.xlu1 %492  ;;  %v408_v48 = vpop.permute.xlu2 %407 }
 0x194   : > { %v497_v49 = vsel %vm496_vm6, %v491_v46, %v493_v47  ;;  %v498_v50 = vsel %vm496_vm6, %v493_v47, %v495_v37  ;;  %v476_v51 = vpop.permute.xlu0 %475  ;;  %414 = vst.msk [vmem:[#allocation3 + $0x18] sm:$0xff] %vm399_vm3, %v408_v48  ;;  %v591_v37 = vld [vmem:[%s999_s7] sm:$0xff] }
 0x195   : > { %559 = vmatpush.msra.mxu2 %v497_v49  ;;  %502 = vst.msk [vmem:[#allocation3 + $0x78] sm:$0xff] %vm399_vm3, %v498_v50 }
 0x19b   : > { %v478_v52 = vpop.permute.xlu1 %477  ;;  %v660_v54 = vpop.permute.xlu2 %659  ;;  %v526_v17 = vld [vmem:[#allocation3 + $0x18] sm:$0xff] }
 0x19c   : > { %v479_v55 = vsel %vm399_vm3, %v476_v51, %v478_v52  ;;  %483 = vst.msk [vmem:[#allocation3 + $0x68] sm:$0xff] %vm399_vm3, %v478_v52  ;;  %v464_v56 = vpop.permute.xlu0 %463  ;;  %v661_v57 = vrot.slane %v660_v54, 1  ;;  %v538_v59 = vld [vmem:[#allocation3 + $0x78] sm:$0xff] }
 0x19d   : > { %v466_v58 = vsel %vm465_vm7, %v462_v40, %v464_v56  ;;  %560 = vmatpush.msra.mxu2 %v479_v55  ;;  %579 = vmatpush.msra.mxu3 %v538_v59  ;;  %470 = vst.msk [vmem:[#allocation3 + $0x58] sm:$0xff] %vm399_vm3, %v464_v56 }
 0x19e   : > { %v662_v60 = vsel %vm451_vm8, %v660_v54, %v661_v57 }
 0x19f   : > { %561 = vmatpush.msra.mxu2 %v466_v58  ;;  %665 = vst.msk [vmem:[#allocation4 + $0x2] ss:$8 sm:$0x3] %vm948_vm9, %v662_v60 }
 0x1a3   : > { %v448_v62 = vpop.permute.xlu1 %447  ;;  %v693_v63 = vpop.permute.xlu2 %692  ;;  %v536_v0 = vld [vmem:[#allocation3 + $0x68] sm:$0xff] }
 0x1a4   : > { %v452_v1 = vsel %vm451_vm8, %v448_v62, %v450_v42  ;;  %v434_v2 = vpop.permute.xlu0 %433  ;;  %v694_v3 = vrot.slane %v693_v63, 1  ;;  %580 = vmatpush.msra.mxu3 %v536_v0  ;;  %v534_v5 = vld [vmem:[#allocation3 + $0x58] sm:$0xff] }
 0x1a5   : > { %562 = vmatpush.msra.mxu2 %v452_v1 }
 0x1a6   : > { %v695_v4 = vsel %vm451_vm8, %v693_v63, %v694_v3  ;;  %581 = vmatpush.msra.mxu3 %v534_v5 }
 0x1a7   : > { %698 = vst.msk [vmem:[#allocation4 + $0x5] ss:$8 sm:$0x3] %vm948_vm9, %v695_v4 }
 0x1a8   : > { %582 = vmatpush.msra.mxu3 %v532_v6 }
 0x1ab   : > { %v436_v7 = vpop.permute.xlu1 %435 }
 0x1ac   : > { %v438_v8 = vsel %vm437_vm10, %v434_v2, %v436_v7  ;;  %442 = vst.msk [vmem:[#allocation3 + $0x38] sm:$0xff] %vm399_vm3, %v436_v7  ;;  %v422_v9 = vpop.permute.xlu0 %421 }
 0x1ad   : > { %v424_v10 = vsel %vm423_vm11, %v420_v44, %v422_v9  ;;  %563 = vmatpush.msra.mxu2 %v438_v8  ;;  %428 = vst.msk [vmem:[#allocation3 + $0x28] sm:$0xff] %vm399_vm3, %v422_v9 }
 0x1af   : > { %564 = vmatpush.msra.mxu2 %v424_v10 }
 0x1b3   : > { %v406_v11 = vpop.permute.xlu1 %405  ;;  %v530_v12 = vld [vmem:[#allocation3 + $0x38] sm:$0xff] }
 0x1b4   : > { %v545_v13 = vpop.permute.xlu0 %544  ;;  %v410_v14 = vsel %vm409_vm12, %v406_v11, %v408_v48  ;;  %583 = vmatpush.msra.mxu3 %v530_v12  ;;  %v528_v16 = vld [vmem:[#allocation3 + $0x28] sm:$0xff] }
 0x1b5   : > { %565 = vmatpush.msra.mxu2 %v410_v14 }
 0x1b6   : > { %584 = vmatpush.msra.mxu3 %v528_v16 }
 0x1b7   : > { %566 = vmatpush.msra.mxu2 %v923_v29 }
 0x1b8   : > { %796 = vmatmul.msk.f32.vlgmr.msra.gmra.mxu2 %vm547_vm13, %v522_v15  ;;  %585 = vmatpush.msra.mxu3 %v526_v17 }
 0x1ba   : > { %586 = vmatpush.msra.mxu3 %v524_v18 }
 0x1bb   : > { %v643_v19 = vpop.permute.xlu1 %642  ;;  %797 = vmatmul.msk.f32.vlgmr.msra.gmra.mxu3 %vm547_vm13, %v522_v15 }
 0x1bc   : > { %v644_v20 = vrot.slane %v643_v19, 1  ;;  %v671_v21 = vpop.permute.xlu0 %670 }
 0x1bd   : > { %v672_v22 = vrot.slane %v671_v21, 1 }
 0x1be   : > { %v645_v23 = vsel %vm451_vm8, %v643_v19, %v644_v20 }
 0x1bf   : > { %651 = vst.msk [vmem:[#allocation4] ss:$8 sm:$0x3] %vm948_vm9, %v645_v23  ;;  %v673_v24 = vsel %vm451_vm8, %v671_v21, %v672_v22 }
 0x1c0   : > { %654 = vst.msk [vmem:[#allocation4 + $0x1] ss:$8 sm:$0x3] %vm948_vm9, %v645_v23 }
 0x1c1   : > { %676 = vst.msk [vmem:[#allocation4 + $0x3] ss:$8 sm:$0x3] %vm948_vm9, %v673_v24 }
 0x1c3   : > { %v682_v25 = vpop.permute.xlu1 %681 }
 0x1c4   : > { %v683_v26 = vrot.slane %v682_v25, 1  ;;  %v704_v27 = vpop.permute.xlu0 %703 }
 0x1c5   : > { %v705_v28 = vrot.slane %v704_v27, 1 }
 0x1c6   : > { %v684_v29 = vsel %vm451_vm8, %v682_v25, %v683_v26 }
 0x1c7   : > { %687 = vst.msk [vmem:[#allocation4 + $0x4] ss:$8 sm:$0x3] %vm948_vm9, %v684_v29  ;;  %v706_v30 = vsel %vm451_vm8, %v704_v27, %v705_v28 }
 0x1c8   : > { %709 = vst.msk [vmem:[#allocation4 + $0x6] ss:$8 sm:$0x3] %vm948_vm9, %v706_v30 }
 0x1cb   : > { %v715_v31 = vpop.permute.xlu1 %714 }
 0x1cc   : > { %v716_v32 = vrot.slane %v715_v31, 1 }
 0x1ce   : > { %v717_v33 = vsel %vm451_vm8, %v715_v31, %v716_v32 }
 0x1cf   : > { %720 = vst.msk [vmem:[#allocation4 + $0x7] ss:$8 sm:$0x3] %vm948_vm9, %v717_v33 }
 0x1d6   : > { %v722_v42 = vld [vmem:[#allocation4] sm:$0xff]  ;;  %v723_v45 = vld [vmem:[#allocation4 + $0x8] sm:$0xff] }
 0x23b   : > { %v568_v34 = vpop.f32.mrf.mxu2 }
 0x23c   : > { %v569_v35 = vadd.f32 %v568_v34, %v545_v13 }
 0x23e   : > { %v592_v36 = vmax.f32 %v569_v35, 0.0  ;;  %v588_v38 = vpop.f32.mrf.mxu3 }
 0x23f   : > { %v589_v39 = vadd.f32 %v588_v38, %v545_v13 }
 0x240   : > { %613 = vmatpush.msrb.mxu0 %v592_v36 }
 0x241   : > { %798 = vmatmul.msk.f32.vlgmr.msrb.gmra.mxu0 %vm594_vm14, %v591_v37  ;;  %v593_v40 = vmax.f32 %v589_v39, 0.0 }
 0x243   : > { %633 = vmatpush.msrb.mxu1 %v593_v40 }
 0x244   : > { %799 = vmatmul.msk.f32.vlgmr.msrb.gmra.mxu1 %vm594_vm14, %v591_v37 }
 0x2be   : > { %v615_v41 = vpop.f32.mrf.mxu0 }
 0x2bf   : > { %v724_v43 = vadd.f32 %v722_v42, %v615_v41 }
 0x2c1   : > { %726 = vst [vmem:[%s305_s16] sm:$0xff] %v724_v43  ;;  %v635_v44 = vpop.f32.mrf.mxu1 }
 0x2c2   : > { %v725_v46 = vadd.f32 %v723_v45, %v635_v44 }
 0x2c4   : > { %727 = vst.msk [vmem:[%s305_s16 + $0x8] sm:$0xff] %vm399_vm3, %v725_v46 }
 0x2c5 PF: > { %s18_s27 = sadd.s32 1, %s831_s27  }
 0x2c6   : > { %p15_p4 = scmp.ge.s32.totalorder %s18_s27, 4  }
 0x2c8   :  { %17 = sbr.rel (!%p15_p4) target bundleno = 1 (0x1), region = 95 }

</bundles_post_ra>
